<compile_context>
chip_gen: v6e
topology: v6e:2x2x1
jax: 0.10.0
libtpu: 0.0.40
codegen_flags: <defaults>
</compile_context>

<pallas_src>
import functools

import jax
import jax.numpy as jnp
import numpy as np
from jax.experimental import pallas as pl
from jax.experimental.pallas import tpu as pltpu


def _round_up(n, m):
    return ((n + m - 1) // m) * m


def _conv_geometry(input_shape):
    """Spatial sizes after conv1 (k=3, s=4) and conv2 (k=1, s=2)."""
    _, H, W = input_shape
    oh1 = (H - 3) // 4 + 1
    ow1 = (W - 3) // 4 + 1
    oh2 = (oh1 - 1) // 2 + 1
    ow2 = (ow1 - 1) // 2 + 1
    return oh1, ow1, oh2, ow2


# ----------------------------------------------------------------------------
# Fused Pallas kernel: whole DQN forward = 5 matmul + bias (+ ReLU) layers on
# VMEM-resident operands.  Weights are bf16, activations cast to bf16 only at
# the MXU inputs; accumulation, bias-add and ReLU are f32.
# ----------------------------------------------------------------------------
def _dqn_fused_kernel(x_ref, w1_ref, w2_ref, w3_ref, w4_ref, w5_ref, b_ref,
                      o_ref):
    def layer(h, w_ref, bias_row, relu):
        n = w_ref.shape[1]
        y = jnp.dot(h.astype(jnp.bfloat16), w_ref[...],
                    preferred_element_type=jnp.float32)
        y = y + b_ref[bias_row:bias_row + 1, :n]          # f32 bias-add
        return jnp.maximum(y, 0.0) if relu else y

    h = x_ref[...]                        # (MP, C*H*W) f32, K = 1024 lane-aligned
    h = layer(h, w1_ref, 0, True)         # conv1 (im2col + conv2 stride-2 folded in)
    h = layer(h, w2_ref, 1, True)         # conv2 (1x1, per-pixel block-diag)
    h = layer(h, w3_ref, 2, True)         # conv3 (1x1, per-pixel block-diag)
    h = layer(h, w4_ref, 3, True)         # fc1   (channel-major flatten folded in)
    o_ref[...] = layer(h, w5_ref, 4, False).astype(o_ref.dtype)   # fc2


def _dqn_fused_call(x2d, w1, w2, w3, w4, w5, b_all):
    mp = x2d.shape[0]
    nap = w5.shape[1]
    vmem = pl.BlockSpec(memory_space=pltpu.MemorySpace.VMEM)
    return pl.pallas_call(
        _dqn_fused_kernel,
        out_shape=jax.ShapeDtypeStruct((mp, nap), jnp.float32),
        in_specs=[vmem] * 7,     # whole arrays, single block, VMEM-resident
        out_specs=vmem,          # (MP, 128): lane-dense output store
    )(x2d, w1, w2, w3, w4, w5, b_all)


# ----------------------------------------------------------------------------
# Parameters (PyTorch-equivalent init, pre-laid-out for the fused kernel).
# ----------------------------------------------------------------------------
def init_dqn_params(key, input_shape, num_actions, *,
                    weight_dtype=jnp.bfloat16):
    C, H, W = input_shape
    _, _, oh2, ow2 = _conv_geometry(input_shape)
    P = oh2 * ow2                        # pixels surviving conv2's stride-2
    conv_out = 64 * P                    # == PyTorch conv_out_size
    KC = C * 9                           # conv1 fan-in (c, kh, kw)
    NAP = _round_up(num_actions, 128)    # lane-dense fc2 output width
    CHW = C * H * W

    ks = jax.random.split(key, 10)

    def u(k, shape, fan_in):
        bound = 1.0 / float(np.sqrt(fan_in))
        return jax.random.uniform(k, shape, jnp.float32, -bound, bound)

    # conv1: torch weight (32, C, 3, 3).  Fold the im2col gather AND conv2's
    # stride-2 pixel selection into a dense (C*H*W, P*32) matrix at init
    # (exact: conv1 is linear).  Column p*32 + oc, for surviving pixel
    # p = i*OW2 + j, reads input element (c, 8*i + kh, 8*j + kw).
    w1_t = np.asarray(u(ks[0], (32, C, 3, 3), KC))
    w1_fold = np.zeros((CHW, P * 32), np.float32)
    stride = 4 * 2                       # conv1 stride * conv2 stride
    for i in range(oh2):
        for j in range(ow2):
            p = i * ow2 + j
            h0, w0 = i * stride, j * stride
            for c in range(C):
                for kh in range(3):
                    for kw in range(3):
                        row = c * H * W + (h0 + kh) * W + (w0 + kw)
                        w1_fold[row, p * 32:(p + 1) * 32] += w1_t[:, c, kh, kw]
    w1 = jnp.asarray(w1_fold).astype(weight_dtype)           # (CHW, P*32)
    b1 = jnp.tile(u(ks[1], (1, 32), KC), (1, P))              # (1, P*32) f32

    eye_p = jnp.eye(P, dtype=jnp.float32)

    # conv2: 1x1, torch (64, 32, 1, 1) -> (32, 64), block-diag per pixel.
    w2 = jnp.kron(eye_p, u(ks[2], (64, 32), 32).T).astype(weight_dtype)
    b2 = jnp.tile(u(ks[3], (1, 64), 32), (1, P))

    # conv3: 1x1, torch (64, 64, 1, 1) -> (64, 64), block-diag per pixel.
    w3 = jnp.kron(eye_p, u(ks[4], (64, 64), 64).T).astype(weight_dtype)
    b3 = jnp.tile(u(ks[5], (1, 64), 64), (1, P))

    # fc1: torch (512, conv_out).  PyTorch flatten is channel-major (c*P + p);
    # kernel activation columns are pixel-major (p*64 + c) -> permute rows once.
    w4 = u(ks[6], (512, conv_out), conv_out).T                # (conv_out, 512)
    w4 = (w4.reshape(64, P, 512).transpose(1, 0, 2)
            .reshape(P * 64, 512).astype(weight_dtype))
    b4 = u(ks[7], (1, 512), conv_out)

    # fc2: torch (num_actions, 512); pad N to 128 lanes with zero cols/bias.
    w5 = jnp.pad(u(ks[8], (num_actions, 512), 512).T,
                 ((0, 0), (0, NAP - num_actions))).astype(weight_dtype)
    b5 = jnp.pad(u(ks[9], (1, num_actions), 512),
                 ((0, 0), (0, NAP - num_actions)))            # (1, NAP)

    # Pack the 5 biases into ONE f32 array (8 sublanes x max_n lanes): a single
    # prologue DMA instead of five tiny ones.  Row i = bias of layer i+1.
    max_n = _round_up(max(P * 32, P * 64, 512, NAP), 128)
    b_all = jnp.zeros((8, max_n), jnp.float32)
    b_all = b_all.at[0, :P * 32].set(b1[0])
    b_all = b_all.at[1, :P * 64].set(b2[0])
    b_all = b_all.at[2, :P * 64].set(b3[0])
    b_all = b_all.at[3, :512].set(b4[0])
    b_all = b_all.at[4, :NAP].set(b5[0])

    return {"w1": w1, "w2": w2, "w3": w3, "w4": w4, "w5": w5, "b_all": b_all}


# ----------------------------------------------------------------------------
# Forward
# ----------------------------------------------------------------------------
def dqn_forward(params, x, *, num_actions):
    """x: (B, C, H, W) float32 NCHW.  Returns (B, num_actions)."""
    B, C, H, W = x.shape
    MP = _round_up(B, 8)                      # pad batch rows to 8 sublanes
    xf = x.reshape(B, C * H * W)              # contiguous reshape (no copy)
    xf = jnp.pad(xf, ((0, MP - B), (0, 0)))   # tiny row pad; im2col gather gone
    out = _dqn_fused_call(xf,
                          params["w1"], params["w2"], params["w3"],
                          params["w4"], params["w5"], params["b_all"])
    return out[:B, :num_actions]              # strip batch + lane padding


if __name__ == "__main__":
    B = 2
    input_shape = (4, 16, 16)   # (C, H, W)
    num_actions = 6

    key = jax.random.PRNGKey(0)
    pkey, xkey = jax.random.split(key)
    params = init_dqn_params(pkey, input_shape, num_actions)
    x = jax.random.normal(xkey, (B,) + input_shape, dtype=jnp.float32)

    fwd = jax.jit(functools.partial(dqn_forward, num_actions=num_actions))
    out = fwd(params, x)
    jax.block_until_ready(out)
    assert out.shape == (B, num_actions)
    print("KERNEL_OK")
</pallas_src>

<mosaic_0001>
module attributes {stable_mosaic.version = 11 : i64} {
  func.func @_dqn_fused_kernel(%arg0: memref<8x1024xf32, #tpu.memory_space<vmem>>, %arg1: memref<1024x128xbf16, #tpu.memory_space<vmem>>, %arg2: memref<128x256xbf16, #tpu.memory_space<vmem>>, %arg3: memref<256x256xbf16, #tpu.memory_space<vmem>>, %arg4: memref<256x512xbf16, #tpu.memory_space<vmem>>, %arg5: memref<512x128xbf16, #tpu.memory_space<vmem>>, %arg6: memref<8x512xf32, #tpu.memory_space<vmem>>, %arg7: memref<8x128xf32, #tpu.memory_space<vmem>>) attributes {dimension_semantics = [], scalar_prefetch = 0 : i64, scratch_operands = 0 : i64, tpu.core_type = #tpu.core_type<tc>} {
    %c0 = arith.constant 0 : index
    %c0_0 = arith.constant 0 : index
    %0 = vector.load %arg0[%c0, %c0_0] : memref<8x1024xf32, #tpu.memory_space<vmem>>, vector<8x1024xf32>
    %1 = arith.truncf %0 : vector<8x1024xf32> to vector<8x1024xbf16>
    %c0_1 = arith.constant 0 : index
    %c0_2 = arith.constant 0 : index
    %2 = vector.load %arg1[%c0_1, %c0_2] : memref<1024x128xbf16, #tpu.memory_space<vmem>>, vector<1024x128xbf16>
    %cst = arith.constant dense<0.000000e+00> : vector<8x128xf32>
    %3 = tpu.matmul %1, %2, %cst {dimension_numbers = #tpu.dot_dimension_numbers<[1], [0], [0], [1], [0, 0, 1, 1], [], []>} : vector<8x1024xbf16>, vector<1024x128xbf16>, vector<8x128xf32> -> vector<8x128xf32>
    %c0_3 = arith.constant 0 : index
    %c0_4 = arith.constant 0 : index
    %4 = vector.load %arg6[%c0_3, %c0_4] : memref<8x512xf32, #tpu.memory_space<vmem>>, vector<1x128xf32>
    %5 = vector.broadcast %4 : vector<1x128xf32> to vector<8x128xf32>
    %6 = arith.addf %3, %5 : vector<8x128xf32>
    %cst_5 = arith.constant 0.000000e+00 : f32
    %7 = vector.broadcast %cst_5 : f32 to vector<8x128xf32>
    %8 = arith.maximumf %6, %7 : vector<8x128xf32>
    %9 = arith.truncf %8 : vector<8x128xf32> to vector<8x128xbf16>
    %c0_6 = arith.constant 0 : index
    %c0_7 = arith.constant 0 : index
    %10 = vector.load %arg2[%c0_6, %c0_7] : memref<128x256xbf16, #tpu.memory_space<vmem>>, vector<128x256xbf16>
    %cst_8 = arith.constant dense<0.000000e+00> : vector<8x256xf32>
    %11 = tpu.matmul %9, %10, %cst_8 {dimension_numbers = #tpu.dot_dimension_numbers<[1], [0], [0], [1], [0, 0, 1, 1], [], []>} : vector<8x128xbf16>, vector<128x256xbf16>, vector<8x256xf32> -> vector<8x256xf32>
    %c1 = arith.constant 1 : index
    %c0_9 = arith.constant 0 : index
    %12 = vector.load %arg6[%c1, %c0_9] : memref<8x512xf32, #tpu.memory_space<vmem>>, vector<1x256xf32>
    %13 = vector.broadcast %12 : vector<1x256xf32> to vector<8x256xf32>
    %14 = arith.addf %11, %13 : vector<8x256xf32>
    %cst_10 = arith.constant 0.000000e+00 : f32
    %15 = vector.broadcast %cst_10 : f32 to vector<8x256xf32>
    %16 = arith.maximumf %14, %15 : vector<8x256xf32>
    %17 = arith.truncf %16 : vector<8x256xf32> to vector<8x256xbf16>
    %c0_11 = arith.constant 0 : index
    %c0_12 = arith.constant 0 : index
    %18 = vector.load %arg3[%c0_11, %c0_12] : memref<256x256xbf16, #tpu.memory_space<vmem>>, vector<256x256xbf16>
    %cst_13 = arith.constant dense<0.000000e+00> : vector<8x256xf32>
    %19 = tpu.matmul %17, %18, %cst_13 {dimension_numbers = #tpu.dot_dimension_numbers<[1], [0], [0], [1], [0, 0, 1, 1], [], []>} : vector<8x256xbf16>, vector<256x256xbf16>, vector<8x256xf32> -> vector<8x256xf32>
    %c2 = arith.constant 2 : index
    %c0_14 = arith.constant 0 : index
    %20 = vector.load %arg6[%c2, %c0_14] : memref<8x512xf32, #tpu.memory_space<vmem>>, vector<1x256xf32>
    %21 = vector.broadcast %20 : vector<1x256xf32> to vector<8x256xf32>
    %22 = arith.addf %19, %21 : vector<8x256xf32>
    %cst_15 = arith.constant 0.000000e+00 : f32
    %23 = vector.broadcast %cst_15 : f32 to vector<8x256xf32>
    %24 = arith.maximumf %22, %23 : vector<8x256xf32>
    %25 = arith.truncf %24 : vector<8x256xf32> to vector<8x256xbf16>
    %c0_16 = arith.constant 0 : index
    %c0_17 = arith.constant 0 : index
    %26 = vector.load %arg4[%c0_16, %c0_17] : memref<256x512xbf16, #tpu.memory_space<vmem>>, vector<256x512xbf16>
    %cst_18 = arith.constant dense<0.000000e+00> : vector<8x512xf32>
    %27 = tpu.matmul %25, %26, %cst_18 {dimension_numbers = #tpu.dot_dimension_numbers<[1], [0], [0], [1], [0, 0, 1, 1], [], []>} : vector<8x256xbf16>, vector<256x512xbf16>, vector<8x512xf32> -> vector<8x512xf32>
    %c3 = arith.constant 3 : index
    %c0_19 = arith.constant 0 : index
    %28 = vector.load %arg6[%c3, %c0_19] : memref<8x512xf32, #tpu.memory_space<vmem>>, vector<1x512xf32>
    %29 = vector.broadcast %28 : vector<1x512xf32> to vector<8x512xf32>
    %30 = arith.addf %27, %29 : vector<8x512xf32>
    %cst_20 = arith.constant 0.000000e+00 : f32
    %31 = vector.broadcast %cst_20 : f32 to vector<8x512xf32>
    %32 = arith.maximumf %30, %31 : vector<8x512xf32>
    %33 = arith.truncf %32 : vector<8x512xf32> to vector<8x512xbf16>
    %c0_21 = arith.constant 0 : index
    %c0_22 = arith.constant 0 : index
    %34 = vector.load %arg5[%c0_21, %c0_22] : memref<512x128xbf16, #tpu.memory_space<vmem>>, vector<512x128xbf16>
    %cst_23 = arith.constant dense<0.000000e+00> : vector<8x128xf32>
    %35 = tpu.matmul %33, %34, %cst_23 {dimension_numbers = #tpu.dot_dimension_numbers<[1], [0], [0], [1], [0, 0, 1, 1], [], []>} : vector<8x512xbf16>, vector<512x128xbf16>, vector<8x128xf32> -> vector<8x128xf32>
    %c4 = arith.constant 4 : index
    %c0_24 = arith.constant 0 : index
    %36 = vector.load %arg6[%c4, %c0_24] : memref<8x512xf32, #tpu.memory_space<vmem>>, vector<1x128xf32>
    %37 = vector.broadcast %36 : vector<1x128xf32> to vector<8x128xf32>
    %38 = arith.addf %35, %37 : vector<8x128xf32>
    %c0_25 = arith.constant 0 : index
    %c0_26 = arith.constant 0 : index
    %39 = vector.load %arg7[%c0_25, %c0_26] : memref<8x128xf32, #tpu.memory_space<vmem>>, vector<8x128xf32>
    tpu.vector_store %arg7[%c0_25, %c0_26], %38 {strides = array<i32>} : memref<8x128xf32, #tpu.memory_space<vmem>>, vector<8x128xf32>,
    return
  }
}

</mosaic_0001>

<bundles_post_ra>
// kernel: dqn_forward.1
= control target key start
LH: loop header
LB: loop body
LE: loop exit
PB: predicated region body
PF: predicated region fallthrough
CT: control target
= control target key end

     0   :  { %12 = vsyncpa [#allocation3], 0  ;;  %s2892_s0 = inlined_call_operand.vmem [shape: f32[8,1024], index: 0, kind: input, shape index: {}]   ;;  %s2893_s1 = inlined_call_operand.hbm [shape: bf16[1024,128], index: 1, kind: input, shape index: {}]   ;;  %s2894_s2 = inlined_call_operand.vmem [shape: bf16[128,256], index: 2, kind: input, shape index: {}]   ;;  %s2895_s3 = inlined_call_operand.hbm [shape: bf16[256,256], index: 3, kind: input, shape index: {}]   ;;  %s2896_s4 = inlined_call_operand.hbm [shape: bf16[256,512], index: 4, kind: input, shape index: {}]   ;;  %s2897_s5 = inlined_call_operand.hbm [shape: bf16[512,128], index: 5, kind: input, shape index: {}]   ;;  %s2898_s6 = inlined_call_operand.vmem [shape: f32[8,512], index: 6, kind: input, shape index: {}]   ;;  %s2899_s7 = inlined_call_operand.vmem [shape: f32[8,128], index: 7, kind: output, shape index: {}]  }
   0x1   :  { %13 = vsyncpa [#allocation5], 0 }
   0x2   :  { %14 = vsyncpa [#allocation8], 0  ;;  %s2723_s24 = smov [#allocation4]  }
   0x3   :  { %s36_s25 = sshll.u32 %s2723_s24, 4  ;;  %s37_s25 = int_to_ptr.vmem [resolvable:$true] %s36_s25 }
   0x4   :  { %s2645_s26 = scalar_lea.vmem %s37_s25, 4096  ;;  %p2650_p1 = scmp.lt.s32.totalorder %s37_s25, %s37_s25 }
   0x5   :  { %p2646_p0 = scmp.ne.s32.totalorder %s37_s25, %s2645_s26  ;;  %p2651_p2 = scmp.lt.s32.totalorder %s2645_s26, %s2645_s26 }
   0x7   :  { %p2652_p3 = por %p2651_p2, %p2650_p1 }
   0x9   :  { %p2653_p4 = pnand %p2652_p3, %p2646_p0 }
   0xb   :  { %2656 = shalt.err (!%p2653_p4)
}
   0xc   :  { %s2724_s27 = smov 128   ;;  %s2725_s28 = smov 8  }
   0xd   :  { %42 = dma.hbm_to_vmem [thread:$0]  %s2895_s3, 4096, %s37_s25, [#allocation5], %s2724_s27, %s2724_s27, %s2725_s28  }
   0xe   :  { %s2726_s8 = smov [#allocation2]  }
   0xf   :  { %s22_s9 = sshll.u32 %s2726_s8, 4  ;;  %s23_s9 = int_to_ptr.vmem [resolvable:$true] %s22_s9 }
  0x10   :  { %s2665_s10 = scalar_lea.vmem %s23_s9, 8192  ;;  %p2670_p6 = scmp.lt.s32.totalorder %s23_s9, %s23_s9 }
  0x11   :  { %p2666_p5 = scmp.ne.s32.totalorder %s23_s9, %s2665_s10  ;;  %p2671_p7 = scmp.lt.s32.totalorder %s2665_s10, %s2665_s10 }
  0x13   :  { %p2672_p8 = por %p2671_p7, %p2670_p6 }
  0x15   :  { %p2673_p9 = pnand %p2672_p8, %p2666_p5 }
  0x17   :  { %2676 = shalt.err (!%p2673_p9)
}
  0x18   :  { %s2727_s11 = smov 64   ;;  %s2728_s12 = smov 4  }
  0x19   :  { %28 = dma.hbm_to_vmem [thread:$0]  %s2893_s1, 8192, %s23_s9, [#allocation3], %s2727_s11, %s2727_s11, %s2728_s12  }
  0x1a   :  { %s2729_s15 = smov [#allocation6]  }
  0x1b   :  { %s48_s16 = sshll.u32 %s2729_s15, 4  ;;  %s49_s16 = int_to_ptr.vmem [resolvable:$true] %s48_s16 }
  0x1c   :  { %s2685_s3 = scalar_lea.vmem %s49_s16, 8192  ;;  %p2690_p11 = scmp.lt.s32.totalorder %s49_s16, %s49_s16 }
  0x1d   :  { %p2686_p10 = scmp.ne.s32.totalorder %s49_s16, %s2685_s3  ;;  %p2691_p12 = scmp.lt.s32.totalorder %s2685_s3, %s2685_s3 }
  0x1f   :  { %p2692_p13 = por %p2691_p12, %p2690_p11 }
  0x21   :  { %p2693_p0 = pnand %p2692_p13, %p2686_p10 }
  0x23   :  { %2696 = shalt.err (!%p2693_p0)
}
  0x24   :  { %s2730_s17 = smov 256   ;;  %s2731_s18 = smov 16  }
  0x25   :  { %54 = dma.hbm_to_vmem [thread:$0]  %s2896_s4, 8192, %s49_s16, [#allocation5], %s2730_s17, %s2730_s17, %s2731_s18  }
  0x26   :  { %s2732_s21 = smov [#allocation7]  }
  0x27   :  { %s60_s22 = sshll.u32 %s2732_s21, 4  ;;  %s61_s22 = int_to_ptr.vmem [resolvable:$true] %s60_s22 }
  0x28   :  { %s2705_s1 = scalar_lea.vmem %s61_s22, 4096  ;;  %p2710_p2 = scmp.lt.s32.totalorder %s61_s22, %s61_s22 }
  0x29   :  { %p2706_p1 = scmp.ne.s32.totalorder %s61_s22, %s2705_s1  ;;  %p2711_p3 = scmp.lt.s32.totalorder %s2705_s1, %s2705_s1 }
  0x2b   :  { %p2712_p4 = por %p2711_p3, %p2710_p2 }
  0x2d   :  { %p2713_p5 = pnand %p2712_p4, %p2706_p1 }
  0x2f   :  { %2716 = shalt.err (!%p2713_p5)
}
  0x30   :  { %66 = dma.hbm_to_vmem [thread:$0]  %s2897_s5, 4096, %s61_s22, [#allocation8], %s2727_s11, %s2727_s11, %s2728_s12  }
  0x31   :  { %2717 = dma.done.wait [#allocation3], 8192  }
  0x32   :  { %2718 = vsyncadd [#allocation3], 4294959104 }
  0x33   :  { %2719 = dma.done.wait [#allocation5], 12288  }
  0x34   :  { %2720 = vsyncadd [#allocation5], 4294955008 }
  0x35   :  { %2721 = dma.done.wait [#allocation8], 4096  }
  0x36   :  { %2722 = vsyncadd [#allocation8], 4294963200  ;;  %v2373_v0 = vld [vmem:[#allocation2 + $0x78] sm:$0xff]   ;;  %v2377_v4 = vld [vmem:[#allocation2 + $0x70] sm:$0xff]  }
  0x37   :  { %v2374_v1 = vld [vmem:[#allocation2 + $0xf8] sm:$0xff]   ;;  %2230 = vmatprep.subr.bf16.mxu0 %v2373_v0  ;;  %v2378_v5 = vld [vmem:[#allocation2 + $0xf0] sm:$0xff]   ;;  %v2381_v8 = vld [vmem:[#allocation2 + $0x68] sm:$0xff]  }
  0x38   :  { %v2375_v2 = vld [vmem:[#allocation2 + $0x38] sm:$0xff]   ;;  %2252 = vmatprep.subr.bf16.mxu1 %v2374_v1  ;;  %v2379_v6 = vld [vmem:[#allocation2 + $0x30] sm:$0xff]   ;;  %v2382_v9 = vld [vmem:[#allocation2 + $0xe8] sm:$0xff]  }
  0x39   :  { %v2376_v3 = vld [vmem:[#allocation2 + $0xb8] sm:$0xff]   ;;  %2231 = vmatpush3.bf16.msra.mxu0 %v2375_v2  ;;  %v2380_v7 = vld [vmem:[#allocation2 + $0xb0] sm:$0xff]   ;;  %v2383_v10 = vld [vmem:[#allocation2 + $0x28] sm:$0xff]  }
  0x3a   :  { %2253 = vmatpush3.bf16.msra.mxu1 %v2376_v3  ;;  %2232 = vmatprep.subr.bf16.mxu0 %v2377_v4  ;;  %v2384_v11 = vld [vmem:[#allocation2 + $0xa8] sm:$0xff]   ;;  %v2385_v12 = vld [vmem:[#allocation2 + $0x60] sm:$0xff]   ;;  %v2389_v16 = vld [vmem:[#allocation2 + $0x58] sm:$0xff]  }
  0x3b   :  { %2254 = vmatprep.subr.bf16.mxu1 %v2378_v5  ;;  %v2386_v13 = vld [vmem:[#allocation2 + $0xe0] sm:$0xff]   ;;  %v2390_v17 = vld [vmem:[#allocation2 + $0xd8] sm:$0xff]   ;;  %v2393_v20 = vld [vmem:[#allocation2 + $0x50] sm:$0xff]  }
  0x3c   :  { %v2387_v14 = vld [vmem:[#allocation2 + $0x20] sm:$0xff]   ;;  %v2391_v18 = vld [vmem:[#allocation2 + $0x18] sm:$0xff]   ;;  %v2394_v21 = vld [vmem:[#allocation2 + $0xd0] sm:$0xff]  }
  0x3d   :  { %2233 = vmatpush3.bf16.msra.mxu0 %v2379_v6  ;;  %v2388_v15 = vld [vmem:[#allocation2 + $0xa0] sm:$0xff]   ;;  %v2392_v19 = vld [vmem:[#allocation2 + $0x98] sm:$0xff]   ;;  %v2395_v22 = vld [vmem:[#allocation2 + $0x10] sm:$0xff]  }
  0x3e   :  { %2255 = vmatpush3.bf16.msra.mxu1 %v2380_v7  ;;  %2234 = vmatprep.subr.bf16.mxu0 %v2381_v8  ;;  %v2396_v23 = vld [vmem:[#allocation2 + $0x90] sm:$0xff]   ;;  %v2397_v24 = vld [vmem:[#allocation2 + $0x48] sm:$0xff]   ;;  %v2401_v28 = vld [vmem:[#allocation2 + $0x40] sm:$0xff]  }
  0x3f   :  { %2256 = vmatprep.subr.bf16.mxu1 %v2382_v9  ;;  %v2398_v25 = vld [vmem:[#allocation2 + $0xc8] sm:$0xff]   ;;  %v2402_v29 = vld [vmem:[#allocation2 + $0xc0] sm:$0xff]   ;;  %v85_v33 = vld [vmem:[%s2892_s0 + $0x18] sm:$0xff] }
  0x40   :  { %v2399_v26 = vld [vmem:[#allocation2 + $0x8] sm:$0xff]   ;;  %v2403_v30 = vld [vmem:[#allocation2] sm:$0xff]   ;;  %v93_v36 = vpack.c.bf16 %v85_v33, %v85_v33  ;;  %v84_v38 = vld [vmem:[%s2892_s0 + $0x10] sm:$0xff] }
  0x41   :  { %2235 = vmatpush3.bf16.msra.mxu0 %v2383_v10  ;;  %v2400_v27 = vld [vmem:[#allocation2 + $0x88] sm:$0xff]   ;;  %v2404_v31 = vld [vmem:[#allocation2 + $0x80] sm:$0xff]   ;;  %v92_v39 = vpack.c.bf16 %v84_v38, %v84_v38  ;;  %v2405_v40 = vld [vmem:[#allocation2 + $0x178] sm:$0xff]  }
  0x42   :  { %2257 = vmatpush3.bf16.msra.mxu1 %v2384_v11  ;;  %2236 = vmatprep.subr.bf16.mxu0 %v2385_v12  ;;  %v83_v32 = vld [vmem:[%s2892_s0 + $0x8] sm:$0xff]  ;;  %v82_v34 = vld [vmem:[%s2892_s0] sm:$0xff]  ;;  %v2406_v41 = vld [vmem:[#allocation2 + $0x1f8] sm:$0xff]  }
  0x43   :  { %2258 = vmatprep.subr.bf16.mxu1 %v2386_v13  ;;  %v91_v35 = vpack.c.bf16 %v83_v32, %v83_v32  ;;  %v90_v37 = vpack.c.bf16 %v82_v34, %v82_v34  ;;  %683 = vmatprep.mubr.bf16.mxu1 %v93_v36  ;;  %v2407_v42 = vld [vmem:[#allocation2 + $0x138] sm:$0xff]   ;;  %v2409_v44 = vld [vmem:[#allocation2 + $0x170] sm:$0xff]   ;;  %v2413_v48 = vld [vmem:[#allocation2 + $0x168] sm:$0xff]   ;;  %v2733_v32 = vmov 0  }
  0x44   :  { %v2408_v43 = vld [vmem:[#allocation2 + $0x1b8] sm:$0xff]   ;;  %v2410_v45 = vld [vmem:[#allocation2 + $0x1f0] sm:$0xff]   ;;  %v2414_v49 = vld [vmem:[#allocation2 + $0x1e8] sm:$0xff]  }
  0x45   :  { %2237 = vmatpush3.bf16.msra.mxu0 %v2387_v14  ;;  %643 = vmatprep.mubr.bf16.mxu0 %v91_v35  ;;  %v2411_v46 = vld [vmem:[#allocation2 + $0x130] sm:$0xff]   ;;  %v2415_v50 = vld [vmem:[#allocation2 + $0x128] sm:$0xff]   ;;  %v2417_v52 = vld [vmem:[#allocation2 + $0x160] sm:$0xff]  }
  0x46   :  { %2259 = vmatpush3.bf16.msra.mxu1 %v2388_v15  ;;  %2238 = vmatprep.subr.bf16.mxu0 %v2389_v16  ;;  %v2412_v47 = vld [vmem:[#allocation2 + $0x1b0] sm:$0xff]   ;;  %v2416_v51 = vld [vmem:[#allocation2 + $0x1a8] sm:$0xff]   ;;  %v2418_v53 = vld [vmem:[#allocation2 + $0x1e0] sm:$0xff]  }
  0x47   :  { %2260 = vmatprep.subr.bf16.mxu1 %v2390_v17  ;;  %v2419_v54 = vld [vmem:[#allocation2 + $0x120] sm:$0xff]   ;;  %v2421_v56 = vld [vmem:[#allocation2 + $0x158] sm:$0xff]   ;;  %v2425_v60 = vld [vmem:[#allocation2 + $0x150] sm:$0xff]  }
  0x48   :  { %v2420_v55 = vld [vmem:[#allocation2 + $0x1a0] sm:$0xff]   ;;  %v2422_v57 = vld [vmem:[#allocation2 + $0x1d8] sm:$0xff]   ;;  %v2426_v61 = vld [vmem:[#allocation2 + $0x1d0] sm:$0xff]  }
  0x49   :  { %2239 = vmatpush3.bf16.msra.mxu0 %v2391_v18  ;;  %v2423_v58 = vld [vmem:[#allocation2 + $0x118] sm:$0xff]   ;;  %v2427_v62 = vld [vmem:[#allocation2 + $0x110] sm:$0xff]   ;;  %v2429_v0 = vld [vmem:[#allocation2 + $0x148] sm:$0xff]  }
  0x4a   :  { %2261 = vmatpush3.bf16.msra.mxu1 %v2392_v19  ;;  %2240 = vmatprep.subr.bf16.mxu0 %v2393_v20  ;;  %v2424_v59 = vld [vmem:[#allocation2 + $0x198] sm:$0xff]   ;;  %v2428_v63 = vld [vmem:[#allocation2 + $0x190] sm:$0xff]   ;;  %v2430_v1 = vld [vmem:[#allocation2 + $0x1c8] sm:$0xff]  }
  0x4b   :  { %2262 = vmatprep.subr.bf16.mxu1 %v2394_v21  ;;  %v2431_v2 = vld [vmem:[#allocation2 + $0x108] sm:$0xff]   ;;  %v2433_v4 = vld [vmem:[#allocation2 + $0x140] sm:$0xff]   ;;  %v89_v9 = vld [vmem:[%s2892_s0 + $0x38] sm:$0xff] }
  0x4c   :  { %v2432_v3 = vld [vmem:[#allocation2 + $0x188] sm:$0xff]   ;;  %v2434_v5 = vld [vmem:[#allocation2 + $0x1c0] sm:$0xff]   ;;  %v97_v11 = vpack.c.bf16 %v89_v9, %v89_v9  ;;  %v88_v13 = vld [vmem:[%s2892_s0 + $0x30] sm:$0xff] }
  0x4d   :  { %2241 = vmatpush3.bf16.msra.mxu0 %v2395_v22  ;;  %v2435_v6 = vld [vmem:[#allocation2 + $0x100] sm:$0xff]   ;;  %v87_v8 = vld [vmem:[%s2892_s0 + $0x28] sm:$0xff]  ;;  %v96_v15 = vpack.c.bf16 %v88_v13, %v88_v13  ;;  %v2437_v16 = vld [vmem:[%s2894_s2 + $0x70] ss:$8 sps:$4 sm:$0xff]  }
  0x4e   :  { %2263 = vmatpush3.bf16.msra.mxu1 %v2396_v23  ;;  %2242 = vmatprep.subr.bf16.mxu0 %v2397_v24  ;;  %v2436_v7 = vld [vmem:[#allocation2 + $0x180] sm:$0xff]   ;;  %v95_v10 = vpack.c.bf16 %v87_v8, %v87_v8  ;;  %v2439_v17 = vld [vmem:[%s2894_s2 + $0x74] ss:$8 sps:$4 sm:$0xff]   ;;  %v2443_v21 = vld [vmem:[%s2894_s2 + $0x50] ss:$8 sps:$4 sm:$0xff]  }
  0x4f   :  { %2264 = vmatprep.subr.bf16.mxu1 %v2398_v25  ;;  %v86_v12 = vld [vmem:[%s2892_s0 + $0x20] sm:$0xff]  ;;  %v2445_v20 = vld [vmem:[%s2894_s2 + $0x54] ss:$8 sps:$4 sm:$0xff]   ;;  %v2449_v25 = vld [vmem:[%s2894_s2 + $0x30] ss:$8 sps:$4 sm:$0xff]  }
  0x50   :  { %v94_v14 = vpack.c.bf16 %v86_v12, %v86_v12  ;;  %v2442_v18 = vld [vmem:[%s2894_s2 + $0x64] ss:$8 sps:$4 sm:$0xff]   ;;  %v2440_v19 = vld [vmem:[%s2894_s2 + $0x60] ss:$8 sps:$4 sm:$0xff]   ;;  %v2451_v24 = vld [vmem:[%s2894_s2 + $0x34] ss:$8 sps:$4 sm:$0xff]  }
  0x51   :  { %2243 = vmatpush3.bf16.msra.mxu0 %v2399_v26  ;;  %v2448_v22 = vld [vmem:[%s2894_s2 + $0x44] ss:$8 sps:$4 sm:$0xff]   ;;  %v2446_v23 = vld [vmem:[%s2894_s2 + $0x40] ss:$8 sps:$4 sm:$0xff]   ;;  %v2461_v33 = vld [vmem:[#allocation4 + $0x70] ss:$8 sps:$4 sm:$0xff]  }
  0x52   :  { %2265 = vmatpush3.bf16.msra.mxu1 %v2400_v27  ;;  %2244 = vmatprep.subr.bf16.mxu0 %v2401_v28  ;;  %v2454_v26 = vld [vmem:[%s2894_s2 + $0x24] ss:$8 sps:$4 sm:$0xff]   ;;  %v2452_v27 = vld [vmem:[%s2894_s2 + $0x20] ss:$8 sps:$4 sm:$0xff]   ;;  %v2457_v28 = vld [vmem:[%s2894_s2 + $0x14] ss:$8 sps:$4 sm:$0xff]  }
  0x53   :  { %2266 = vmatprep.subr.bf16.mxu1 %v2402_v29  ;;  %v2455_v29 = vld [vmem:[%s2894_s2 + $0x10] ss:$8 sps:$4 sm:$0xff]   ;;  %v2463_v34 = vld [vmem:[#allocation4 + $0x74] ss:$8 sps:$4 sm:$0xff]   ;;  %v2466_v35 = vld [vmem:[#allocation4 + $0x64] ss:$8 sps:$4 sm:$0xff]  }
  0x54   :  { %v2464_v36 = vld [vmem:[#allocation4 + $0x60] ss:$8 sps:$4 sm:$0xff]   ;;  %v2467_v38 = vld [vmem:[#allocation4 + $0x50] ss:$8 sps:$4 sm:$0xff]  }
  0x55   :  { %2245 = vmatpush3.bf16.msra.mxu0 %v2403_v30  ;;  %v2460_v30 = vld [vmem:[%s2894_s2 + $0x4] ss:$8 sps:$4 sm:$0xff]  }
  0x56   :  { %2267 = vmatpush3.bf16.msra.mxu1 %v2404_v31  ;;  %2274 = vmatprep.subr.bf16.mxu0 %v2405_v40  ;;  %v2458_v31 = vld [vmem:[%s2894_s2] ss:$8 sps:$4 sm:$0xff]  }
  0x57   :  { %2296 = vmatprep.subr.bf16.mxu1 %v2406_v41  ;;  %v2470_v40 = vld [vmem:[#allocation4 + $0x40] ss:$8 sps:$4 sm:$0xff]   ;;  %v2475_v41 = vld [vmem:[#allocation4 + $0x34] ss:$8 sps:$4 sm:$0xff]  }
  0x58   :  { %644 = vmatmul.mubr.bf16.vlgmr.msra.gmra.mxu0 %v90_v37  ;;  %v2469_v37 = vld [vmem:[#allocation4 + $0x54] ss:$8 sps:$4 sm:$0xff]  }
  0x59   :  { %684 = vmatmul.mubr.bf16.vlgmr.msra.gmra.mxu1 %v92_v39  ;;  %2275 = vmatpush3.bf16.msra.mxu0 %v2407_v42  ;;  %v2472_v39 = vld [vmem:[#allocation4 + $0x44] ss:$8 sps:$4 sm:$0xff]   ;;  %v2473_v42 = vld [vmem:[#allocation4 + $0x30] ss:$8 sps:$4 sm:$0xff]  }
  0x5a   :  { %2297 = vmatpush3.bf16.msra.mxu1 %v2408_v43  ;;  %2276 = vmatprep.subr.bf16.mxu0 %v2409_v44  ;;  %v2478_v43 = vld [vmem:[#allocation4 + $0x24] ss:$8 sps:$4 sm:$0xff]   ;;  %v2476_v44 = vld [vmem:[#allocation4 + $0x20] ss:$8 sps:$4 sm:$0xff]  }
  0x5b   :  { %2298 = vmatprep.subr.bf16.mxu1 %v2410_v45  ;;  %723 = vmatprep.mubr.bf16.mxu0 %v95_v10  ;;  %v2481_v45 = vld [vmem:[#allocation4 + $0x14] ss:$8 sps:$4 sm:$0xff]  }
  0x5c   :  { %763 = vmatprep.mubr.bf16.mxu1 %v97_v11 }
  0x5d   :  { %2277 = vmatpush3.bf16.msra.mxu0 %v2411_v46  ;;  %v2479_v46 = vld [vmem:[#allocation4 + $0x10] ss:$8 sps:$4 sm:$0xff]  }
  0x5e   :  { %2299 = vmatpush3.bf16.msra.mxu1 %v2412_v47  ;;  %2278 = vmatprep.subr.bf16.mxu0 %v2413_v48  ;;  %v2484_v47 = vld [vmem:[#allocation4 + $0x4] ss:$8 sps:$4 sm:$0xff]   ;;  %v2482_v48 = vld [vmem:[#allocation4] ss:$8 sps:$4 sm:$0xff]  }
  0x5f   :  { %2300 = vmatprep.subr.bf16.mxu1 %v2414_v49  ;;  %v2487_v49 = vld [vmem:[#allocation4 + $0xf4] ss:$8 sps:$4 sm:$0xff]  }
  0x61   :  { %2279 = vmatpush3.bf16.msra.mxu0 %v2415_v50  ;;  %v2485_v50 = vld [vmem:[#allocation4 + $0xf0] ss:$8 sps:$4 sm:$0xff]  }
  0x62   :  { %2301 = vmatpush3.bf16.msra.mxu1 %v2416_v51  ;;  %2280 = vmatprep.subr.bf16.mxu0 %v2417_v52  ;;  %v2490_v51 = vld [vmem:[#allocation4 + $0xe4] ss:$8 sps:$4 sm:$0xff]   ;;  %v2488_v52 = vld [vmem:[#allocation4 + $0xe0] ss:$8 sps:$4 sm:$0xff]  }
  0x63   :  { %2302 = vmatprep.subr.bf16.mxu1 %v2418_v53  ;;  %v2493_v53 = vld [vmem:[#allocation4 + $0xd4] ss:$8 sps:$4 sm:$0xff]  }
  0x65   :  { %2281 = vmatpush3.bf16.msra.mxu0 %v2419_v54  ;;  %v2491_v54 = vld [vmem:[#allocation4 + $0xd0] ss:$8 sps:$4 sm:$0xff]  }
  0x66   :  { %2303 = vmatpush3.bf16.msra.mxu1 %v2420_v55  ;;  %2282 = vmatprep.subr.bf16.mxu0 %v2421_v56  ;;  %v2496_v55 = vld [vmem:[#allocation4 + $0xc4] ss:$8 sps:$4 sm:$0xff]   ;;  %v2494_v56 = vld [vmem:[#allocation4 + $0xc0] ss:$8 sps:$4 sm:$0xff]  }
  0x67   :  { %2304 = vmatprep.subr.bf16.mxu1 %v2422_v57  ;;  %v2499_v57 = vld [vmem:[#allocation4 + $0xb4] ss:$8 sps:$4 sm:$0xff]  }
  0x69   :  { %2283 = vmatpush3.bf16.msra.mxu0 %v2423_v58  ;;  %v2497_v58 = vld [vmem:[#allocation4 + $0xb0] ss:$8 sps:$4 sm:$0xff]  }
  0x6a   :  { %2305 = vmatpush3.bf16.msra.mxu1 %v2424_v59  ;;  %2284 = vmatprep.subr.bf16.mxu0 %v2425_v60  ;;  %v2502_v59 = vld [vmem:[#allocation4 + $0xa4] ss:$8 sps:$4 sm:$0xff]   ;;  %v2500_v60 = vld [vmem:[#allocation4 + $0xa0] ss:$8 sps:$4 sm:$0xff]  }
  0x6b   :  { %2306 = vmatprep.subr.bf16.mxu1 %v2426_v61 }
  0x6d   :  { %2285 = vmatpush3.bf16.msra.mxu0 %v2427_v62 }
  0x6e   :  { %2307 = vmatpush3.bf16.msra.mxu1 %v2428_v63  ;;  %2286 = vmatprep.subr.bf16.mxu0 %v2429_v0 }
  0x6f   :  { %2308 = vmatprep.subr.bf16.mxu1 %v2430_v1 }
  0x71   :  { %2287 = vmatpush3.bf16.msra.mxu0 %v2431_v2 }
  0x72   :  { %2309 = vmatpush3.bf16.msra.mxu1 %v2432_v3  ;;  %2288 = vmatprep.subr.bf16.mxu0 %v2433_v4 }
  0x73   :  { %2310 = vmatprep.subr.bf16.mxu1 %v2434_v5 }
  0x75   :  { %2289 = vmatpush3.bf16.msra.mxu0 %v2435_v6  ;;  %v226_v6 = vld [vmem:[%s2898_s6] ss:$0 sm:$0xff] }
  0x76   :  { %2311 = vmatpush3.bf16.msra.mxu1 %v2436_v7  ;;  %882 = vmatprep.subr.bf16.mxu0 %v2439_v17 }
  0x77   :  { %1132 = vmatprep.subr.bf16.mxu1 %v2463_v34  ;;  %v2521_v34 = vld [vmem:[#allocation6 + $0xa0] ss:$16 sps:$4 sm:$0xff]  }
  0x78   :  { %724 = vmatmul.mubr.bf16.vlgmr.msra.gmra.mxu0 %v94_v14 }
  0x79   :  { %764 = vmatmul.mubr.bf16.vlgmr.msra.gmra.mxu1 %v96_v15  ;;  %883 = vmatpush1.bf16.msra.mxu0 %v2437_v16 }
  0x7a   :  { %884 = vmatprep.subr.bf16.mxu0 %v2442_v18  ;;  %914 = vmatprep.mubr.bf16.mxu0 %v2733_v32  ;;  %v2515_v32 = vld [vmem:[#allocation6 + $0xc0] ss:$16 sps:$4 sm:$0xff]  }
  0x7b   :  { %1133 = vmatpush1.bf16.msra.mxu1 %v2461_v33  ;;  %v2523_v33 = vld [vmem:[#allocation6 + $0xa4] ss:$16 sps:$4 sm:$0xff]  }
  0x7c   :  { %1134 = vmatprep.subr.bf16.mxu1 %v2466_v35  ;;  %v2529_v35 = vld [vmem:[#allocation6 + $0x84] ss:$16 sps:$4 sm:$0xff]  }
  0x7d   :  { %885 = vmatpush1.bf16.msra.mxu0 %v2440_v19 }
  0x7e   :  { %886 = vmatprep.subr.bf16.mxu0 %v2445_v20 }
  0x7f   :  { %1135 = vmatpush1.bf16.msra.mxu1 %v2464_v36  ;;  %v2527_v36 = vld [vmem:[#allocation6 + $0x80] ss:$16 sps:$4 sm:$0xff]  }
  0x80   :  { %1136 = vmatprep.subr.bf16.mxu1 %v2469_v37  ;;  %v2535_v37 = vld [vmem:[#allocation6 + $0x64] ss:$16 sps:$4 sm:$0xff]  }
  0x81   :  { %887 = vmatpush1.bf16.msra.mxu0 %v2443_v21 }
  0x82   :  { %888 = vmatprep.subr.bf16.mxu0 %v2448_v22 }
  0x83   :  { %1137 = vmatpush1.bf16.msra.mxu1 %v2467_v38  ;;  %v2533_v38 = vld [vmem:[#allocation6 + $0x60] ss:$16 sps:$4 sm:$0xff]  }
  0x84   :  { %1138 = vmatprep.subr.bf16.mxu1 %v2472_v39  ;;  %v2541_v39 = vld [vmem:[#allocation6 + $0x44] ss:$16 sps:$4 sm:$0xff]  }
  0x85   :  { %889 = vmatpush1.bf16.msra.mxu0 %v2446_v23 }
  0x86   :  { %890 = vmatprep.subr.bf16.mxu0 %v2451_v24  ;;  %v2505_v24 = vld [vmem:[#allocation4 + $0x94] ss:$8 sps:$4 sm:$0xff]  }
  0x87   :  { %1139 = vmatpush1.bf16.msra.mxu1 %v2470_v40  ;;  %v2539_v40 = vld [vmem:[#allocation6 + $0x40] ss:$16 sps:$4 sm:$0xff]  }
  0x88   :  { %1140 = vmatprep.subr.bf16.mxu1 %v2475_v41  ;;  %v2547_v41 = vld [vmem:[#allocation6 + $0x24] ss:$16 sps:$4 sm:$0xff]  }
  0x89   :  { %891 = vmatpush1.bf16.msra.mxu0 %v2449_v25  ;;  %v2503_v25 = vld [vmem:[#allocation4 + $0x90] ss:$8 sps:$4 sm:$0xff]  }
  0x8a   :  { %892 = vmatprep.subr.bf16.mxu0 %v2454_v26  ;;  %v2508_v26 = vld [vmem:[#allocation4 + $0x84] ss:$8 sps:$4 sm:$0xff]  }
  0x8b   :  { %1141 = vmatpush1.bf16.msra.mxu1 %v2473_v42  ;;  %v2545_v42 = vld [vmem:[#allocation6 + $0x20] ss:$16 sps:$4 sm:$0xff]  }
  0x8c   :  { %1142 = vmatprep.subr.bf16.mxu1 %v2478_v43  ;;  %v2553_v43 = vld [vmem:[#allocation6 + $0x4] ss:$16 sps:$4 sm:$0xff]  }
  0x8d   :  { %893 = vmatpush1.bf16.msra.mxu0 %v2452_v27  ;;  %v2506_v27 = vld [vmem:[#allocation4 + $0x80] ss:$8 sps:$4 sm:$0xff]  }
  0x8e   :  { %894 = vmatprep.subr.bf16.mxu0 %v2457_v28  ;;  %v2509_v28 = vld [vmem:[#allocation6 + $0xe0] ss:$16 sps:$4 sm:$0xff]  }
  0x8f   :  { %1143 = vmatpush1.bf16.msra.mxu1 %v2476_v44  ;;  %v2551_v44 = vld [vmem:[#allocation6] ss:$16 sps:$4 sm:$0xff]  }
  0x90   :  { %1144 = vmatprep.subr.bf16.mxu1 %v2481_v45  ;;  %v2559_v45 = vld [vmem:[#allocation6 + $0x1e4] ss:$16 sps:$4 sm:$0xff]  }
  0x91   :  { %895 = vmatpush1.bf16.msra.mxu0 %v2455_v29  ;;  %v2511_v29 = vld [vmem:[#allocation6 + $0xe4] ss:$16 sps:$4 sm:$0xff]  }
  0x92   :  { %896 = vmatprep.subr.bf16.mxu0 %v2460_v30  ;;  %v2514_v30 = vld [vmem:[#allocation6 + $0xec] ss:$16 sps:$4 sm:$0xff]  }
  0x93   :  { %1145 = vmatpush1.bf16.msra.mxu1 %v2479_v46  ;;  %v2557_v46 = vld [vmem:[#allocation6 + $0x1e0] ss:$16 sps:$4 sm:$0xff]  }
  0x94   :  { %1146 = vmatprep.subr.bf16.mxu1 %v2484_v47  ;;  %v2565_v47 = vld [vmem:[#allocation6 + $0x1c4] ss:$16 sps:$4 sm:$0xff]  }
  0x95   :  { %897 = vmatpush1.bf16.msra.mxu0 %v2458_v31  ;;  %v2517_v31 = vld [vmem:[#allocation6 + $0xc4] ss:$16 sps:$4 sm:$0xff]  }
  0x96   :  { %1584 = vmatprep.subr.bf16.mxu0 %v2511_v29  ;;  %v2574_v29 = vld [vmem:[#allocation6 + $0x1ac] ss:$16 sps:$4 sm:$0xff]  }
  0x97   :  { %1147 = vmatpush1.bf16.msra.mxu1 %v2482_v48  ;;  %v2563_v48 = vld [vmem:[#allocation6 + $0x1c0] ss:$16 sps:$4 sm:$0xff]  }
  0x98   :  { %1148 = vmatprep.subr.bf16.mxu1 %v2487_v49  ;;  %v2571_v49 = vld [vmem:[#allocation6 + $0x1a4] ss:$16 sps:$4 sm:$0xff]  }
  0x9b   :  { %1149 = vmatpush2.bf16.msra.mxu1 %v2485_v50  ;;  %v2569_v50 = vld [vmem:[#allocation6 + $0x1a0] ss:$16 sps:$4 sm:$0xff]  }
  0x9c   :  { %1150 = vmatprep.subr.bf16.mxu1 %v2490_v51  ;;  %v2577_v51 = vld [vmem:[#allocation6 + $0x184] ss:$16 sps:$4 sm:$0xff]  }
  0x9f   :  { %1151 = vmatpush2.bf16.msra.mxu1 %v2488_v52  ;;  %v2575_v52 = vld [vmem:[#allocation6 + $0x180] ss:$16 sps:$4 sm:$0xff]  }
  0xa0   :  { %1152 = vmatprep.subr.bf16.mxu1 %v2493_v53  ;;  %v2583_v53 = vld [vmem:[#allocation6 + $0x164] ss:$16 sps:$4 sm:$0xff]  }
  0xa3   :  { %1153 = vmatpush2.bf16.msra.mxu1 %v2491_v54  ;;  %v2581_v54 = vld [vmem:[#allocation6 + $0x160] ss:$16 sps:$4 sm:$0xff]  }
  0xa4   :  { %1154 = vmatprep.subr.bf16.mxu1 %v2496_v55  ;;  %v2589_v55 = vld [vmem:[#allocation6 + $0x144] ss:$16 sps:$4 sm:$0xff]  }
  0xa7   :  { %1155 = vmatpush2.bf16.msra.mxu1 %v2494_v56  ;;  %v2587_v56 = vld [vmem:[#allocation6 + $0x140] ss:$16 sps:$4 sm:$0xff]  }
  0xa8   :  { %1156 = vmatprep.subr.bf16.mxu1 %v2499_v57  ;;  %v792_v57 = vlaneseq }
  0xab   :  { %1157 = vmatpush2.bf16.msra.mxu1 %v2497_v58  ;;  %v2861_v58 = vshrl.u32 %v792_v57, 7 }
  0xac   :  { %1158 = vmatprep.subr.bf16.mxu1 %v2502_v59 }
  0xad   :  { %v2864_v59 = vsub.s32 0, %v2861_v58 }
  0xaf   :  { %1159 = vmatpush2.bf16.msra.mxu1 %v2500_v60  ;;  %v2083_v60 = vld [vmem:[%s2898_s6 + $0x1] ss:$8 sm:$0x3] }
  0xb0   :  { %1160 = vmatprep.subr.bf16.mxu1 %v2505_v24  ;;  %v2554_v24 = vld [vmem:[#allocation6 + $0x8] ss:$16 sps:$4 sm:$0xff]  }
  0xb3   :  { %1161 = vmatpush2.bf16.msra.mxu1 %v2503_v25  ;;  %v2562_v25 = vld [vmem:[#allocation6 + $0x1ec] ss:$16 sps:$4 sm:$0xff]  }
  0xb4   :  { %1162 = vmatprep.subr.bf16.mxu1 %v2508_v26  ;;  %v2560_v26 = vld [vmem:[#allocation6 + $0x1e8] ss:$16 sps:$4 sm:$0xff]  }
  0xb7   :  { %1163 = vmatpush2.bf16.msra.mxu1 %v2506_v27  ;;  %v2568_v27 = vld [vmem:[#allocation6 + $0x1cc] ss:$16 sps:$4 sm:$0xff]  }
  0xb8   :  { %1625 = vmatprep.subr.bf16.mxu1 %v2514_v30  ;;  %v2572_v30 = vld [vmem:[#allocation6 + $0x1a8] ss:$16 sps:$4 sm:$0xff]  }
 0x118   :  { %v2246_v61 = vpop.f32.mrf.mxu0 }
 0x119   :  { %v2268_v62 = vpop.f32.mrf.mxu1 }
 0x11a   :  { %v2247_v63 = vpop.f32.mrf.mxu0 }
 0x11b   :  { %v2269_v0 = vpop.f32.mrf.mxu1  ;;  %v2248_v5 = vadd.f32 %v2247_v63, %v2246_v61  ;;  %v2870_v61 = vsub.s32 1, %v2861_v58 }
 0x11c   :  { %v2249_v1 = vpop.f32.mrf.mxu0  ;;  %v2270_v8 = vadd.f32 %v2269_v0, %v2268_v62  ;;  %v795_v62 = vrot.slane %v2083_v60, %v2864_v59 }
 0x11d   :  { %v2271_v2 = vpop.f32.mrf.mxu1  ;;  %v646_v7 = vadd.f32 %v2248_v5, %v226_v6  ;;  %v799_v63 = vrot.slane %v2083_v60, %v2870_v61  ;;  %v2606_v60 = vld [vmem:[#allocation7 + $0x38] sm:$0xff]  }
 0x11e   :  { %v2250_v3 = vpop.f32.mrf.mxu0 }
 0x11f   :  { %v2272_v4 = vpop.f32.mrf.mxu1  ;;  %v686_v12 = vadd.f32 %v2270_v8, %v646_v7 }
 0x138   :  { %v2290_v9 = vpop.f32.mrf.mxu0 }
 0x139   :  { %v2312_v10 = vpop.f32.mrf.mxu1 }
 0x13a   :  { %v2291_v11 = vpop.f32.mrf.mxu0 }
 0x13b   :  { %v2292_v13 = vadd.f32 %v2291_v11, %v2290_v9  ;;  %v2313_v14 = vpop.f32.mrf.mxu1  ;;  %v2512_v9 = vld [vmem:[#allocation6 + $0xe8] ss:$16 sps:$4 sm:$0xff]   ;;  %v2520_v11 = vld [vmem:[#allocation6 + $0xcc] ss:$16 sps:$4 sm:$0xff]  }
 0x13c   :  { %v2293_v15 = vpop.f32.mrf.mxu0  ;;  %v2314_v17 = vadd.f32 %v2313_v14, %v2312_v10  ;;  %v2524_v14 = vld [vmem:[#allocation6 + $0xa8] ss:$16 sps:$4 sm:$0xff]  }
 0x13d   :  { %v726_v16 = vadd.f32 %v2292_v13, %v686_v12  ;;  %v2315_v18 = vpop.f32.mrf.mxu1  ;;  %v2518_v12 = vld [vmem:[#allocation6 + $0xc8] ss:$16 sps:$4 sm:$0xff]   ;;  %v2526_v13 = vld [vmem:[#allocation6 + $0xac] ss:$16 sps:$4 sm:$0xff]  }
 0x13e   :  { %v2294_v19 = vpop.f32.mrf.mxu0  ;;  %v2532_v15 = vld [vmem:[#allocation6 + $0x8c] ss:$16 sps:$4 sm:$0xff]   ;;  %v2536_v18 = vld [vmem:[#allocation6 + $0x68] ss:$16 sps:$4 sm:$0xff]  }
 0x13f   :  { %v766_v20 = vadd.f32 %v2314_v17, %v726_v16  ;;  %v2316_v21 = vpop.f32.mrf.mxu1  ;;  %v2530_v16 = vld [vmem:[#allocation6 + $0x88] ss:$16 sps:$4 sm:$0xff]   ;;  %v2538_v17 = vld [vmem:[#allocation6 + $0x6c] ss:$16 sps:$4 sm:$0xff]  }
 0x140   :  { %v2544_v19 = vld [vmem:[#allocation6 + $0x4c] ss:$16 sps:$4 sm:$0xff]  }
 0x141   :  { %v771_v22 = vmax.f32 %v766_v20, 0.0  ;;  %v2542_v20 = vld [vmem:[#allocation6 + $0x48] ss:$16 sps:$4 sm:$0xff]   ;;  %v2550_v21 = vld [vmem:[#allocation6 + $0x2c] ss:$16 sps:$4 sm:$0xff]  }
 0x143   :  { %v772_v23 = vpack.c.bf16 %v771_v22, %v771_v22  ;;  %v2548_v22 = vld [vmem:[#allocation6 + $0x28] ss:$16 sps:$4 sm:$0xff]  }
 0x145   :  { %915 = vmatmul.mubr.bf16.vlgmr.msra.gmra.mxu0 %v772_v23  ;;  %v2556_v23 = vld [vmem:[#allocation6 + $0xc] ss:$16 sps:$4 sm:$0xff]  }
 0x146   :  { %1585 = vmatpush1.bf16.msra.mxu0 %v2509_v28  ;;  %v2566_v28 = vld [vmem:[#allocation6 + $0x1c8] ss:$16 sps:$4 sm:$0xff]  }
 0x147   :  { %1586 = vmatprep.subr.bf16.mxu0 %v2517_v31  ;;  %v2580_v31 = vld [vmem:[#allocation6 + $0x18c] ss:$16 sps:$4 sm:$0xff]  }
 0x14a   :  { %1587 = vmatpush1.bf16.msra.mxu0 %v2515_v32  ;;  %v2578_v32 = vld [vmem:[#allocation6 + $0x188] ss:$16 sps:$4 sm:$0xff]  }
 0x14b   :  { %1588 = vmatprep.subr.bf16.mxu0 %v2523_v33  ;;  %v2586_v33 = vld [vmem:[#allocation6 + $0x16c] ss:$16 sps:$4 sm:$0xff]  }
 0x14e   :  { %1589 = vmatpush1.bf16.msra.mxu0 %v2521_v34  ;;  %v2584_v34 = vld [vmem:[#allocation6 + $0x168] ss:$16 sps:$4 sm:$0xff]  }
 0x14f   :  { %1590 = vmatprep.subr.bf16.mxu0 %v2529_v35  ;;  %v2592_v35 = vld [vmem:[#allocation6 + $0x14c] ss:$16 sps:$4 sm:$0xff]  }
 0x152   :  { %1591 = vmatpush1.bf16.msra.mxu0 %v2527_v36  ;;  %v2590_v36 = vld [vmem:[#allocation6 + $0x148] ss:$16 sps:$4 sm:$0xff]  }
 0x153   :  { %1592 = vmatprep.subr.bf16.mxu0 %v2535_v37  ;;  %v2595_v37 = vld [vmem:[#allocation6 + $0x124] ss:$16 sps:$4 sm:$0xff]  }
 0x156   :  { %1593 = vmatpush1.bf16.msra.mxu0 %v2533_v38  ;;  %v2598_v38 = vld [vmem:[#allocation6 + $0x12c] ss:$16 sps:$4 sm:$0xff]  }
 0x157   :  { %1594 = vmatprep.subr.bf16.mxu0 %v2541_v39  ;;  %v2593_v39 = vld [vmem:[#allocation6 + $0x120] ss:$16 sps:$4 sm:$0xff]  }
 0x15a   :  { %1595 = vmatpush1.bf16.msra.mxu0 %v2539_v40  ;;  %v2596_v40 = vld [vmem:[#allocation6 + $0x128] ss:$16 sps:$4 sm:$0xff]  }
 0x15b   :  { %1596 = vmatprep.subr.bf16.mxu0 %v2547_v41  ;;  %v2601_v41 = vld [vmem:[#allocation6 + $0x104] ss:$16 sps:$4 sm:$0xff]  }
 0x15e   :  { %1597 = vmatpush1.bf16.msra.mxu0 %v2545_v42  ;;  %v2604_v42 = vld [vmem:[#allocation6 + $0x10c] ss:$16 sps:$4 sm:$0xff]  }
 0x15f   :  { %1598 = vmatprep.subr.bf16.mxu0 %v2553_v43  ;;  %v2599_v43 = vld [vmem:[#allocation6 + $0x100] ss:$16 sps:$4 sm:$0xff]  }
 0x162   :  { %1599 = vmatpush1.bf16.msra.mxu0 %v2551_v44  ;;  %v2602_v44 = vld [vmem:[#allocation6 + $0x108] ss:$16 sps:$4 sm:$0xff]  }
 0x163   :  { %1600 = vmatprep.subr.bf16.mxu0 %v2559_v45  ;;  %v2605_v45 = vld [vmem:[#allocation7 + $0x78] sm:$0xff]  }
 0x166   :  { %1601 = vmatpush2.bf16.msra.mxu0 %v2557_v46  ;;  %v2100_v46 = vld [vmem:[%s2898_s6 + $0x2] ss:$8 sm:$0x3] }
 0x167   :  { %1602 = vmatprep.subr.bf16.mxu0 %v2565_v47  ;;  %v965_v47 = vrot.slane %v2100_v46, %v2864_v59 }
 0x16a   :  { %1603 = vmatpush2.bf16.msra.mxu0 %v2563_v48  ;;  %v969_v48 = vrot.slane %v2100_v46, %v2870_v61 }
 0x16b   :  { %1604 = vmatprep.subr.bf16.mxu0 %v2571_v49 }
 0x16e   :  { %1605 = vmatpush2.bf16.msra.mxu0 %v2569_v50 }
 0x16f   :  { %1606 = vmatprep.subr.bf16.mxu0 %v2577_v51 }
 0x172   :  { %1607 = vmatpush2.bf16.msra.mxu0 %v2575_v52 }
 0x173   :  { %1608 = vmatprep.subr.bf16.mxu0 %v2583_v53 }
 0x176   :  { %1609 = vmatpush2.bf16.msra.mxu0 %v2581_v54 }
 0x177   :  { %1610 = vmatprep.subr.bf16.mxu0 %v2589_v55 }
 0x17a   :  { %1611 = vmatpush2.bf16.msra.mxu0 %v2587_v56 }
 0x17b   :  { %1612 = vmatprep.subr.bf16.mxu0 %v2595_v37  ;;  %v2625_v37 = vld [vmem:[#allocation7 + $0xe8] sm:$0xff]  }
 0x17e   :  { %1613 = vmatpush2.bf16.msra.mxu0 %v2593_v39  ;;  %v2627_v39 = vld [vmem:[#allocation7 + $0xe0] sm:$0xff]  }
 0x17f   :  { %1614 = vmatprep.subr.bf16.mxu0 %v2601_v41  ;;  %v2629_v41 = vld [vmem:[#allocation7 + $0xd8] sm:$0xff]  }
 0x182   :  { %1615 = vmatpush2.bf16.msra.mxu0 %v2599_v43  ;;  %v1254_v43 = vsub.s32 2, %v2861_v58 }
 0x183   :  { %2318 = vmatprep.subr.bf16.mxu0 %v2605_v45  ;;  %v2632_v45 = vld [vmem:[#allocation7 + $0x90] sm:$0xff]  }
 0x205   :  { %v916_v0 = vpop.f32.mrf.mxu0 }
 0x206   :  { %v917_v1 = vadd.f32 %v916_v0, %v795_v62  ;;  %v2608_v0 = vld [vmem:[#allocation7 + $0x30] sm:$0xff]  }
 0x207   :  { %v918_v2 = vpop.f32.mrf.mxu0 }
 0x208   :  { %v919_v3 = vadd.f32 %v918_v2, %v799_v63  ;;  %v923_v4 = vmax.f32 %v917_v1, 0.0  ;;  %v2607_v63 = vld [vmem:[#allocation7 + $0x70] sm:$0xff]   ;;  %v2609_v1 = vld [vmem:[#allocation7 + $0x68] sm:$0xff]  }
 0x209   :  { %v920_v5 = vpop.f32.mrf.mxu0  ;;  %v2610_v2 = vld [vmem:[#allocation7 + $0x28] sm:$0xff]  }
 0x20a   :  { %v924_v6 = vmax.f32 %v919_v3, 0.0  ;;  %v925_v10 = vpack.c.bf16 %v923_v4, %v923_v4  ;;  %v2611_v3 = vld [vmem:[#allocation7 + $0x60] sm:$0xff]   ;;  %v2613_v5 = vld [vmem:[#allocation7 + $0x58] sm:$0xff]  }
 0x20b   :  { %v921_v7 = vpop.f32.mrf.mxu0  ;;  %v2612_v4 = vld [vmem:[#allocation7 + $0x20] sm:$0xff]  }
 0x20c   :  { %v926_v8 = vpack.c.bf16 %v924_v6, %v924_v6  ;;  %v2614_v6 = vld [vmem:[#allocation7 + $0x18] sm:$0xff]   ;;  %v2615_v7 = vld [vmem:[#allocation7 + $0x50] sm:$0xff]  }
 0x20e   :  { %1164 = vmatprep.mubr.bf16.mxu1 %v926_v8  ;;  %v2616_v8 = vld [vmem:[#allocation7 + $0x10] sm:$0xff]  }
 0x20f   :  { %1165 = vmatmul.mubr.bf16.vlgmr.msra.gmra.mxu1 %v925_v10  ;;  %v2618_v10 = vld [vmem:[#allocation7 + $0x8] sm:$0xff]  }
 0x210   :  { %1626 = vmatpush1.bf16.msra.mxu1 %v2512_v9  ;;  %v2617_v9 = vld [vmem:[#allocation7 + $0x48] sm:$0xff]  }
 0x211   :  { %1627 = vmatprep.subr.bf16.mxu1 %v2520_v11  ;;  %v2619_v11 = vld [vmem:[#allocation7 + $0x40] sm:$0xff]  }
 0x214   :  { %1628 = vmatpush1.bf16.msra.mxu1 %v2518_v12  ;;  %v2620_v12 = vld [vmem:[#allocation7] sm:$0xff]  }
 0x215   :  { %1629 = vmatprep.subr.bf16.mxu1 %v2526_v13  ;;  %v2621_v13 = vld [vmem:[#allocation7 + $0xf8] sm:$0xff]  }
 0x218   :  { %1630 = vmatpush1.bf16.msra.mxu1 %v2524_v14  ;;  %v2133_v14 = vld [vmem:[%s2898_s6 + $0x3] ss:$8 sm:$0xf] }
 0x219   :  { %1631 = vmatprep.subr.bf16.mxu1 %v2532_v15  ;;  %v1258_v15 = vsub.s32 3, %v2861_v58  ;;  %v1255_v46 = vrot.slane %v2133_v14, %v1254_v43 }
 0x21c   :  { %1632 = vmatpush1.bf16.msra.mxu1 %v2530_v16  ;;  %v1247_v16 = vrot.slane %v2133_v14, %v2864_v59 }
 0x21d   :  { %1633 = vmatprep.subr.bf16.mxu1 %v2538_v17  ;;  %v1251_v17 = vrot.slane %v2133_v14, %v2870_v61 }
 0x220   :  { %1634 = vmatpush1.bf16.msra.mxu1 %v2536_v18  ;;  %v1259_v18 = vrot.slane %v2133_v14, %v1258_v15 }
 0x221   :  { %1635 = vmatprep.subr.bf16.mxu1 %v2544_v19 }
 0x224   :  { %1636 = vmatpush1.bf16.msra.mxu1 %v2542_v20 }
 0x225   :  { %1637 = vmatprep.subr.bf16.mxu1 %v2550_v21 }
 0x228   :  { %1638 = vmatpush1.bf16.msra.mxu1 %v2548_v22 }
 0x229   :  { %1639 = vmatprep.subr.bf16.mxu1 %v2556_v23 }
 0x22c   :  { %1640 = vmatpush1.bf16.msra.mxu1 %v2554_v24 }
 0x22d   :  { %1641 = vmatprep.subr.bf16.mxu1 %v2562_v25 }
 0x230   :  { %1642 = vmatpush2.bf16.msra.mxu1 %v2560_v26 }
 0x231   :  { %1643 = vmatprep.subr.bf16.mxu1 %v2568_v27 }
 0x234   :  { %1644 = vmatpush2.bf16.msra.mxu1 %v2566_v28 }
 0x235   :  { %1645 = vmatprep.subr.bf16.mxu1 %v2574_v29 }
 0x238   :  { %1646 = vmatpush2.bf16.msra.mxu1 %v2572_v30 }
 0x239   :  { %1647 = vmatprep.subr.bf16.mxu1 %v2580_v31 }
 0x23c   :  { %1648 = vmatpush2.bf16.msra.mxu1 %v2578_v32 }
 0x23d   :  { %1649 = vmatprep.subr.bf16.mxu1 %v2586_v33 }
 0x240   :  { %1650 = vmatpush2.bf16.msra.mxu1 %v2584_v34  ;;  %v2622_v34 = vld [vmem:[#allocation7 + $0xb8] sm:$0xff]  }
 0x241   :  { %1651 = vmatprep.subr.bf16.mxu1 %v2592_v35  ;;  %v2623_v35 = vld [vmem:[#allocation7 + $0xf0] sm:$0xff]  }
 0x244   :  { %1652 = vmatpush2.bf16.msra.mxu1 %v2590_v36  ;;  %v2624_v36 = vld [vmem:[#allocation7 + $0xb0] sm:$0xff]  }
 0x245   :  { %1653 = vmatprep.subr.bf16.mxu1 %v2598_v38  ;;  %v2626_v38 = vld [vmem:[#allocation7 + $0xa8] sm:$0xff]  }
 0x248   :  { %1654 = vmatpush2.bf16.msra.mxu1 %v2596_v40  ;;  %v2628_v40 = vld [vmem:[#allocation7 + $0xa0] sm:$0xff]  }
 0x249   :  { %1655 = vmatprep.subr.bf16.mxu1 %v2604_v42  ;;  %v2630_v42 = vld [vmem:[#allocation7 + $0x98] sm:$0xff]  }
 0x24c   :  { %1656 = vmatpush2.bf16.msra.mxu1 %v2602_v44  ;;  %v2631_v44 = vld [vmem:[#allocation7 + $0xd0] sm:$0xff]  }
 0x2cf   :  { %v1166_v49 = vpop.f32.mrf.mxu1 }
 0x2d0   :  { %v1167_v50 = vadd.f32 %v1166_v49, %v965_v47  ;;  %v2633_v47 = vld [vmem:[#allocation7 + $0xc8] sm:$0xff]  }
 0x2d1   :  { %v1168_v51 = vpop.f32.mrf.mxu1 }
 0x2d2   :  { %v1169_v52 = vadd.f32 %v1168_v51, %v969_v48  ;;  %v1173_v53 = vmax.f32 %v1167_v50, 0.0  ;;  %v2634_v48 = vld [vmem:[#allocation7 + $0x88] sm:$0xff]   ;;  %v2635_v50 = vld [vmem:[#allocation7 + $0xc0] sm:$0xff]  }
 0x2d3   :  { %v1170_v54 = vpop.f32.mrf.mxu1  ;;  %v2636_v51 = vld [vmem:[#allocation7 + $0x80] sm:$0xff]  }
 0x2d4   :  { %v1174_v55 = vmax.f32 %v1169_v52, 0.0  ;;  %v1175_v62 = vpack.c.bf16 %v1173_v53, %v1173_v53 }
 0x2d5   :  { %v1171_v56 = vpop.f32.mrf.mxu1 }
 0x2d6   :  { %v1176_v57 = vpack.c.bf16 %v1174_v55, %v1174_v55 }
 0x2d8   :  { %1616 = vmatprep.mubr.bf16.mxu0 %v1176_v57  ;;  %1657 = vmatprep.mubr.bf16.mxu1 %v1176_v57 }
 0x2d9   :  { %1617 = vmatmul.mubr.bf16.vlgmr.msra.gmra.mxu0 %v1175_v62  ;;  %1658 = vmatmul.mubr.bf16.vlgmr.msra.gmra.mxu1 %v1175_v62 }
 0x2da   :  { %2319 = vmatpush3.bf16.msra.mxu0 %v2606_v60  ;;  %v1738_v60 = vld [vmem:[%s2898_s6 + $0x4] ss:$0 sm:$0xff] }
 0x2db   :  { %2320 = vmatprep.subr.bf16.mxu0 %v2607_v63 }
 0x2de   :  { %2321 = vmatpush3.bf16.msra.mxu0 %v2608_v0 }
 0x2df   :  { %2322 = vmatprep.subr.bf16.mxu0 %v2609_v1 }
 0x2e2   :  { %2323 = vmatpush3.bf16.msra.mxu0 %v2610_v2 }
 0x2e3   :  { %2324 = vmatprep.subr.bf16.mxu0 %v2611_v3 }
 0x2e6   :  { %2325 = vmatpush3.bf16.msra.mxu0 %v2612_v4 }
 0x2e7   :  { %2326 = vmatprep.subr.bf16.mxu0 %v2613_v5 }
 0x2ea   :  { %2327 = vmatpush3.bf16.msra.mxu0 %v2614_v6 }
 0x2eb   :  { %2328 = vmatprep.subr.bf16.mxu0 %v2615_v7 }
 0x2ee   :  { %2329 = vmatpush3.bf16.msra.mxu0 %v2616_v8 }
 0x2ef   :  { %2330 = vmatprep.subr.bf16.mxu0 %v2617_v9 }
 0x2f2   :  { %2331 = vmatpush3.bf16.msra.mxu0 %v2618_v10 }
 0x2f3   :  { %2332 = vmatprep.subr.bf16.mxu0 %v2619_v11 }
 0x2f6   :  { %2333 = vmatpush3.bf16.msra.mxu0 %v2620_v12 }
 0x2f7   :  { %2340 = vmatprep.subr.bf16.mxu0 %v2621_v13 }
 0x399   :  { %v1618_v19 = vpop.f32.mrf.mxu0  ;;  %v1659_v20 = vpop.f32.mrf.mxu1 }
 0x39a   :  { %v1619_v21 = vadd.f32 %v1618_v19, %v1247_v16  ;;  %v1660_v49 = vadd.f32 %v1659_v20, %v1255_v46 }
 0x39b   :  { %v1620_v22 = vpop.f32.mrf.mxu0  ;;  %v1661_v23 = vpop.f32.mrf.mxu1 }
 0x39c   :  { %v1621_v24 = vadd.f32 %v1620_v22, %v1251_v17  ;;  %v1662_v25 = vadd.f32 %v1661_v23, %v1259_v18  ;;  %v1666_v26 = vmax.f32 %v1619_v21, 0.0  ;;  %v1668_v52 = vmax.f32 %v1660_v49, 0.0 }
 0x39d   :  { %v1622_v27 = vpop.f32.mrf.mxu0  ;;  %v1663_v28 = vpop.f32.mrf.mxu1 }
 0x39e   :  { %v1667_v29 = vmax.f32 %v1621_v24, 0.0  ;;  %v1669_v30 = vmax.f32 %v1662_v25, 0.0  ;;  %v1670_v59 = vpack.c.bf16 %v1666_v26, %v1666_v26  ;;  %v1672_v53 = vpack.c.bf16 %v1668_v52, %v1668_v52 }
 0x39f   :  { %v1623_v31 = vpop.f32.mrf.mxu0  ;;  %v1664_v32 = vpop.f32.mrf.mxu1 }
 0x3a0   :  { %v1671_v33 = vpack.c.bf16 %v1667_v29, %v1667_v29  ;;  %v1673_v61 = vpack.c.bf16 %v1669_v30, %v1669_v30 }
 0x3a2   :  { %1963 = vmatprep.mubr.bf16.mxu0 %v1671_v33 }
 0x3a3   :  { %1964 = vmatmul.mubr.bf16.vlgmr.msra.gmra.mxu0 %v1670_v59 }
 0x3a4   :  { %2341 = vmatpush3.bf16.msra.mxu0 %v2622_v34  ;;  %2003 = vmatprep.mubr.bf16.mxu0 %v1673_v61 }
 0x3a5   :  { %2342 = vmatprep.subr.bf16.mxu0 %v2623_v35 }
 0x3a8   :  { %2343 = vmatpush3.bf16.msra.mxu0 %v2624_v36 }
 0x3a9   :  { %2344 = vmatprep.subr.bf16.mxu0 %v2625_v37 }
 0x3ac   :  { %2345 = vmatpush3.bf16.msra.mxu0 %v2626_v38 }
 0x3ad   :  { %2346 = vmatprep.subr.bf16.mxu0 %v2627_v39 }
 0x3b0   :  { %2347 = vmatpush3.bf16.msra.mxu0 %v2628_v40 }
 0x3b1   :  { %2348 = vmatprep.subr.bf16.mxu0 %v2629_v41 }
 0x3b4   :  { %2349 = vmatpush3.bf16.msra.mxu0 %v2630_v42 }
 0x3b5   :  { %2350 = vmatprep.subr.bf16.mxu0 %v2631_v44 }
 0x3b8   :  { %2351 = vmatpush3.bf16.msra.mxu0 %v2632_v45 }
 0x3b9   :  { %2352 = vmatprep.subr.bf16.mxu0 %v2633_v47 }
 0x3bc   :  { %2353 = vmatpush3.bf16.msra.mxu0 %v2634_v48 }
 0x3bd   :  { %2354 = vmatprep.subr.bf16.mxu0 %v2635_v50 }
 0x3c0   :  { %2355 = vmatpush3.bf16.msra.mxu0 %v2636_v51 }
 0x3c3   :  { %2004 = vmatmul.mubr.bf16.vlgmr.msra.gmra.mxu0 %v1672_v53 }
 0x463   :  { %v2334_v58 = vpop.f32.mrf.mxu0 }
 0x465   :  { %v2335_v54 = vpop.f32.mrf.mxu0 }
 0x466   :  { %v2336_v57 = vadd.f32 %v2335_v54, %v2334_v58 }
 0x467   :  { %v2337_v55 = vpop.f32.mrf.mxu0 }
 0x468   :  { %v1966_v0 = vadd.f32 %v2336_v57, %v1738_v60 }
 0x469   :  { %v2338_v56 = vpop.f32.mrf.mxu0 }
 0x483   :  { %v2356_v62 = vpop.f32.mrf.mxu0 }
 0x485   :  { %v2357_v63 = vpop.f32.mrf.mxu0 }
 0x486   :  { %v2358_v1 = vadd.f32 %v2357_v63, %v2356_v62 }
 0x487   :  { %v2359_v2 = vpop.f32.mrf.mxu0 }
 0x488   :  { %v2006_v3 = vadd.f32 %v2358_v1, %v1966_v0 }
 0x489   :  { %v2360_v4 = vpop.f32.mrf.mxu0 }
 0x48a   :  { %2011 = vst [vmem:[%s2899_s7] sm:$0xff] %v2006_v3 }
 0x48b   :  { %2016 = vsyncpa [#allocation3], 1 }
 0x48c   :  { %2017 = vsyncpa [#allocation5], 1 }
 0x48d   :  { %2018 = vsyncpa [#allocation8], 1 }

</bundles_post_ra>
